<compile_context>
chip_gen: v7x
topology: tpu7x:2x2x1
jax: 0.10.0
libtpu: 0.0.40
codegen_flags: <defaults>
</compile_context>

<pallas_src>
import functools

import jax
import jax.numpy as jnp
from jax import lax
from jax.experimental import pallas as pl
from jax.experimental.pallas import tpu as pltpu

GAMMA = 1.5
ALPHA = 0.25

LANES = 128
SUBLANES = 8
MAX_ROW_TILE = 8192                     # 8192 x 128 f32 = 4 MiB per input block
VMEM_LIMIT_BYTES = 48 * 1024 * 1024     # explicit scoped-VMEM limit (<= v7x 64 MiB physical)

# Pad values whose focal loss is exactly 0 in f32:
#   sigmoid(60) == 1.0 in f32  =>  p_t == 1  =>  (1 - p_t)**gamma == 0.
_PAD_LOGIT = 60.0
_PAD_TARGET = 1.0


def _round_up(x, m):
    return (x + m - 1) // m * m


def _tensorcore_count():
    """Best-effort TensorCore count; falls back to 2 (harmless on 1-TC chips,
    since the 2-way split is only used when it divides the tile count exactly)."""
    try:
        info = pltpu.get_tpu_info()
    except Exception:
        return 2
    for attr in ("tensorcore_count", "num_tensorcores", "num_cores", "core_count"):
        n = getattr(info, attr, None)
        if isinstance(n, int) and 1 <= n <= 16:
            return n
    return 2


def _focal_kernel(pred_ref, true_ref, out_ref, acc_ref, *,
                  gamma, alpha, rows, row_tile, n_inner, needs_mask):
    j = pl.program_id(1)

    @pl.when(j == 0)
    def _init():
        acc_ref[...] = jnp.zeros_like(acc_ref)

    x = pred_ref[...].astype(jnp.float32)
    t = true_ref[...].astype(jnp.float32)

    # One exp(-|x|) shared between the stable BCE softplus and the sigmoid;
    # the sigmoid denominator uses a single approx (EUP-only) reciprocal.
    e = jnp.exp(-jnp.abs(x))
    bce = jnp.maximum(x, 0.0) - x * t + jnp.log1p(e)
    inv = pl.reciprocal(1.0 + e, approx=True)
    p = jnp.where(x >= 0.0, inv, e * inv)          # == sigmoid(x)

    p_t = t * p + (1.0 - t) * (1.0 - p)
    alpha_factor = t * alpha + (1.0 - t) * (1.0 - alpha)
    m = jnp.maximum(1.0 - p_t, 0.0)                # clamp fp round-off (benign)
    if gamma == 1.5:
        modulating = m * jnp.sqrt(m)               # m**1.5 without pow (exp+log)
    else:
        modulating = m ** gamma
    loss = bce * alpha_factor * modulating

    if needs_mask:
        # Ragged last row-block: rows >= `rows` hold unspecified boundary-block
        # data; zero them before accumulating.  Row-level mask only: a
        # (row_tile, 1) iota + compare, broadcast into the select.
        tile_idx = pl.program_id(0) * n_inner + j
        remaining = rows - tile_idx * row_tile
        row_ids = lax.broadcasted_iota(jnp.int32, (row_tile, 1), 0)
        loss = jnp.where(row_ids < remaining, loss, 0.0)

    # vreg-aligned accumulation: (row_tile,128) -> (row_tile//8, 8, 128) just
    # regroups whole vregs; the axis-0 sum is plain VPU adds (no XLU).
    acc_ref[...] += loss.reshape(row_tile // SUBLANES, SUBLANES, LANES).sum(axis=0)

    @pl.when(j == n_inner - 1)
    def _finalize():
        out_ref[...] = acc_ref[...]


def focal_loss(pred, true, gamma=GAMMA, alpha=ALPHA, reduction='mean',
               max_row_tile=MAX_ROW_TILE):
    """pred, true: same shape (logits + targets). Returns a scalar (mean/sum)."""
    assert pred.shape == true.shape
    total = int(pred.size)
    max_row_tile = max(SUBLANES, _round_up(int(max_row_tile), SUBLANES))

    pred_flat = pred.reshape(-1)
    true_flat = true.reshape(-1)
    if total % LANES != 0:
        # Only non-lane-aligned totals pay a (small) pad; pad values give
        # exactly zero loss, so no tail masking and no effect on the sum.
        pad = _round_up(total, SUBLANES * LANES) - total
        pred_flat = jnp.pad(pred_flat, (0, pad), constant_values=_PAD_LOGIT)
        true_flat = jnp.pad(true_flat, (0, pad), constant_values=_PAD_TARGET)

    rows = pred_flat.size // LANES
    pred2d = pred_flat.reshape(rows, LANES)        # free reshape, no HBM copy
    true2d = true_flat.reshape(rows, LANES)

    row_tile = min(max_row_tile, _round_up(rows, SUBLANES))
    n_tiles = pl.cdiv(rows, row_tile)

    n_outer = 1
    if n_tiles >= 2 and _tensorcore_count() >= 2:
        if n_tiles % 2:
            # Nudge the tile size down so the tile count is even and the 2-way
            # split never creates a padded / duplicate tile.
            rt2 = _round_up(pl.cdiv(rows, n_tiles + 1), SUBLANES)
            if pl.cdiv(rows, rt2) == n_tiles + 1:
                row_tile, n_tiles = rt2, n_tiles + 1
        if n_tiles % 2 == 0:
            n_outer = 2
    n_inner = n_tiles // n_outer
    needs_mask = (n_tiles * row_tile != rows)

    kernel = functools.partial(
        _focal_kernel, gamma=float(gamma), alpha=float(alpha), rows=rows,
        row_tile=row_tile, n_inner=n_inner, needs_mask=needs_mask)

    n_elems = rows * LANES
    cost = pl.CostEstimate(
        flops=24 * n_elems,
        transcendentals=4 * n_elems,               # exp, log1p, rcp, sqrt
        bytes_accessed=pred2d.nbytes + true2d.nbytes + 4 * n_outer * SUBLANES * LANES,
    )

    partial_sums = pl.pallas_call(
        kernel,
        out_shape=jax.ShapeDtypeStruct((n_outer * SUBLANES, LANES), jnp.float32),
        grid_spec=pltpu.PrefetchScalarGridSpec(
            num_scalar_prefetch=0,
            grid=(n_outer, n_inner),
            in_specs=[
                pl.BlockSpec((row_tile, LANES), lambda o, j: (o * n_inner + j, 0)),
                pl.BlockSpec((row_tile, LANES), lambda o, j: (o * n_inner + j, 0)),
            ],
            out_specs=pl.BlockSpec((SUBLANES, LANES), lambda o, j: (o, 0)),
            scratch_shapes=[pltpu.VMEM((SUBLANES, LANES), jnp.float32)],
        ),
        compiler_params=pltpu.CompilerParams(
            dimension_semantics=("parallel", "arbitrary"),
            vmem_limit_bytes=VMEM_LIMIT_BYTES,
        ),
        cost_estimate=cost,
    )(pred2d, true2d)

    loss_sum = jnp.sum(partial_sums)               # tiny (n_outer*8, 128) reduce
    if reduction == 'mean':
        return loss_sum / jnp.float32(total)
    elif reduction == 'sum':
        return loss_sum
    else:
        # TODO(synk): reduction='none' (full elementwise output) not implemented.
        raise NotImplementedError("reduction='none' not supported")


def _focal_ref(pred, true, gamma=GAMMA, alpha=ALPHA):
    x = pred.astype(jnp.float32)
    t = true.astype(jnp.float32)
    bce = jnp.maximum(x, 0.0) - x * t + jnp.log1p(jnp.exp(-jnp.abs(x)))
    p = jax.nn.sigmoid(x)
    p_t = t * p + (1.0 - t) * (1.0 - p)
    af = t * alpha + (1.0 - t) * (1.0 - alpha)
    mf = (1.0 - p_t) ** gamma
    return jnp.mean(bce * af * mf)


if __name__ == "__main__":
    key = jax.random.PRNGKey(0)
    k1, k2 = jax.random.split(key)

    # Main demo: NCHW logits + soft targets, like YOLOv5 obj/cls losses.
    pred = jax.random.normal(k1, (2, 4, 16, 16), dtype=jnp.float32)
    true = jax.random.uniform(k2, (2, 4, 16, 16), dtype=jnp.float32)
    out = jax.block_until_ready(focal_loss(pred, true))
    ref = _focal_ref(pred, true)
    assert jnp.allclose(out, ref, rtol=5e-3, atol=1e-6), (out, ref)

    # Exercise the remaining code paths at small sizes:
    #  (a) non-lane-aligned total  -> zero-loss pad path
    #  (b) multi-tile reduction with a ragged, masked last block
    #  (c) even tile split across the "parallel" outer axis
    for shape, kwargs in [((3, 5, 7, 9), {}),
                          ((3, 12, 128), dict(max_row_tile=8)),
                          ((2, 16, 128), dict(max_row_tile=8))]:
        ka, kb = jax.random.split(jax.random.PRNGKey(1))
        p = jax.random.normal(ka, shape, dtype=jnp.float32)
        t = jax.random.uniform(kb, shape, dtype=jnp.float32)
        o = jax.block_until_ready(focal_loss(p, t, **kwargs))
        r = _focal_ref(p, t)
        assert jnp.allclose(o, r, rtol=5e-3, atol=1e-6), (shape, o, r)

    print("KERNEL_OK")
</pallas_src>

<mosaic_0001>
module attributes {stable_mosaic.version = 11 : i64} {
  func.func @_focal_kernel(%arg0: i32, %arg1: i32, %arg2: memref<16x128xf32, #tpu.memory_space<vmem>>, %arg3: memref<16x128xf32, #tpu.memory_space<vmem>>, %arg4: memref<8x128xf32, #tpu.memory_space<vmem>>, %arg5: memref<8x128xf32, #tpu.memory_space<vmem>>) attributes {dimension_semantics = [#tpu.dimension_semantics<parallel>, #tpu.dimension_semantics<arbitrary>], iteration_bounds = array<i64: 1, 1>, scalar_prefetch = 0 : i64, scratch_operands = 1 : i64, tpu.core_type = #tpu.core_type<tc>, window_params = [{transform_indices = @transform_0, window_bounds = array<i64: 16, 128>}, {transform_indices = @transform_1, window_bounds = array<i64: 16, 128>}, {transform_indices = @transform_2, window_bounds = array<i64: 8, 128>}]} {
    %c0_i32 = arith.constant 0 : i32
    %0 = arith.cmpi eq, %arg1, %c0_i32 : i32
    %1 = arith.extui %0 : i1 to i32
    %c0_i32_0 = arith.constant 0 : i32
    %2 = arith.cmpi ne, %1, %c0_i32_0 : i32
    scf.if %2 {
      %cst_21 = arith.constant 0.000000e+00 : f32
      %52 = vector.broadcast %cst_21 : f32 to vector<8x128xf32>
      %c0_22 = arith.constant 0 : index
      %c0_23 = arith.constant 0 : index
      %53 = vector.load %arg5[%c0_22, %c0_23] : memref<8x128xf32, #tpu.memory_space<vmem>>, vector<8x128xf32>
      tpu.vector_store %arg5[%c0_22, %c0_23], %52 {strides = array<i32>} : memref<8x128xf32, #tpu.memory_space<vmem>>, vector<8x128xf32>,
    } else {
    }
    %c0 = arith.constant 0 : index
    %c0_1 = arith.constant 0 : index
    %3 = vector.load %arg2[%c0, %c0_1] : memref<16x128xf32, #tpu.memory_space<vmem>>, vector<16x128xf32>
    %c0_2 = arith.constant 0 : index
    %c0_3 = arith.constant 0 : index
    %4 = vector.load %arg3[%c0_2, %c0_3] : memref<16x128xf32, #tpu.memory_space<vmem>>, vector<16x128xf32>
    %5 = math.absf %3 : vector<16x128xf32>
    %cst = arith.constant 0.000000e+00 : f32
    %6 = vector.broadcast %cst : f32 to vector<16x128xf32>
    %7 = arith.subf %6, %5 : vector<16x128xf32>
    %8 = math.exp %7 : vector<16x128xf32>
    %cst_4 = arith.constant 0.000000e+00 : f32
    %9 = vector.broadcast %cst_4 : f32 to vector<16x128xf32>
    %10 = arith.maximumf %3, %9 : vector<16x128xf32>
    %11 = arith.mulf %3, %4 : vector<16x128xf32>
    %12 = arith.subf %10, %11 : vector<16x128xf32>
    %13 = math.log1p %8 : vector<16x128xf32>
    %14 = arith.addf %12, %13 : vector<16x128xf32>
    %cst_5 = arith.constant 1.000000e+00 : f32
    %15 = vector.broadcast %cst_5 : f32 to vector<16x128xf32>
    %16 = arith.addf %15, %8 : vector<16x128xf32>
    %17 = tpu.reciprocal %16 {approx = true} : vector<16x128xf32> -> vector<16x128xf32>
    %cst_6 = arith.constant 0.000000e+00 : f32
    %18 = vector.broadcast %cst_6 : f32 to vector<16x128xf32>
    %19 = arith.cmpf oge, %3, %18 : vector<16x128xf32>
    %20 = arith.mulf %8, %17 : vector<16x128xf32>
    %21 = arith.select %19, %17, %20 : vector<16x128xi1>, vector<16x128xf32>
    %22 = arith.mulf %4, %21 : vector<16x128xf32>
    %cst_7 = arith.constant 1.000000e+00 : f32
    %23 = vector.broadcast %cst_7 : f32 to vector<16x128xf32>
    %24 = arith.subf %23, %4 : vector<16x128xf32>
    %cst_8 = arith.constant 1.000000e+00 : f32
    %25 = vector.broadcast %cst_8 : f32 to vector<16x128xf32>
    %26 = arith.subf %25, %21 : vector<16x128xf32>
    %27 = arith.mulf %24, %26 : vector<16x128xf32>
    %28 = arith.addf %22, %27 : vector<16x128xf32>
    %cst_9 = arith.constant 2.500000e-01 : f32
    %29 = vector.broadcast %cst_9 : f32 to vector<16x128xf32>
    %30 = arith.mulf %4, %29 : vector<16x128xf32>
    %cst_10 = arith.constant 1.000000e+00 : f32
    %31 = vector.broadcast %cst_10 : f32 to vector<16x128xf32>
    %32 = arith.subf %31, %4 : vector<16x128xf32>
    %cst_11 = arith.constant 7.500000e-01 : f32
    %33 = vector.broadcast %cst_11 : f32 to vector<16x128xf32>
    %34 = arith.mulf %32, %33 : vector<16x128xf32>
    %35 = arith.addf %30, %34 : vector<16x128xf32>
    %cst_12 = arith.constant 1.000000e+00 : f32
    %36 = vector.broadcast %cst_12 : f32 to vector<16x128xf32>
    %37 = arith.subf %36, %28 : vector<16x128xf32>
    %cst_13 = arith.constant 0.000000e+00 : f32
    %38 = vector.broadcast %cst_13 : f32 to vector<16x128xf32>
    %39 = arith.maximumf %37, %38 : vector<16x128xf32>
    %40 = math.sqrt %39 : vector<16x128xf32>
    %41 = arith.mulf %39, %40 : vector<16x128xf32>
    %42 = arith.mulf %14, %35 : vector<16x128xf32>
    %43 = arith.mulf %42, %41 : vector<16x128xf32>
    %c0_14 = arith.constant 0 : index
    %c0_15 = arith.constant 0 : index
    %44 = vector.load %arg5[%c0_14, %c0_15] : memref<8x128xf32, #tpu.memory_space<vmem>>, vector<8x128xf32>
    %45 = vector.shape_cast %43 : vector<16x128xf32> to vector<2x8x128xf32>
    %cst_16 = arith.constant dense<0.000000e+00> : vector<8x128xf32>
    %46 = vector.multi_reduction <add>, %45, %cst_16 [0] : vector<2x8x128xf32> to vector<8x128xf32>
    %47 = arith.addf %44, %46 : vector<8x128xf32>
    %c0_17 = arith.constant 0 : index
    %c0_18 = arith.constant 0 : index
    %48 = vector.load %arg5[%c0_17, %c0_18] : memref<8x128xf32, #tpu.memory_space<vmem>>, vector<8x128xf32>
    tpu.vector_store %arg5[%c0_17, %c0_18], %47 {strides = array<i32>} : memref<8x128xf32, #tpu.memory_space<vmem>>, vector<8x128xf32>,
    %c0_i32_19 = arith.constant 0 : i32
    %49 = arith.cmpi eq, %arg1, %c0_i32_19 : i32
    %50 = arith.extui %49 : i1 to i32
    %c0_i32_20 = arith.constant 0 : i32
    %51 = arith.cmpi ne, %50, %c0_i32_20 : i32
    scf.if %51 {
      %c0_21 = arith.constant 0 : index
      %c0_22 = arith.constant 0 : index
      %52 = vector.load %arg5[%c0_21, %c0_22] : memref<8x128xf32, #tpu.memory_space<vmem>>, vector<8x128xf32>
      %c0_23 = arith.constant 0 : index
      %c0_24 = arith.constant 0 : index
      %53 = vector.load %arg4[%c0_23, %c0_24] : memref<8x128xf32, #tpu.memory_space<vmem>>, vector<8x128xf32>
      tpu.vector_store %arg4[%c0_23, %c0_24], %52 {strides = array<i32>} : memref<8x128xf32, #tpu.memory_space<vmem>>, vector<8x128xf32>,
    } else {
    }
    return
  }
  func.func @transform_0(%arg0: i32, %arg1: i32) -> (i32, i32) {
    %c1_i32 = arith.constant 1 : i32
    %0 = arith.muli %arg0, %c1_i32 : i32
    %1 = arith.addi %0, %arg1 : i32
    %c0_i32 = arith.constant 0 : i32
    %c0_i32_0 = arith.constant 0 : i32
    return %1, %c0_i32 : i32, i32
  }
  func.func @transform_1(%arg0: i32, %arg1: i32) -> (i32, i32) {
    %c1_i32 = arith.constant 1 : i32
    %0 = arith.muli %arg0, %c1_i32 : i32
    %1 = arith.addi %0, %arg1 : i32
    %c0_i32 = arith.constant 0 : i32
    %c0_i32_0 = arith.constant 0 : i32
    return %1, %c0_i32 : i32, i32
  }
  func.func @transform_2(%arg0: i32, %arg1: i32) -> (i32, i32) {
    %c0_i32 = arith.constant 0 : i32
    %c0_i32_0 = arith.constant 0 : i32
    return %arg0, %c0_i32 : i32, i32
  }
}

</mosaic_0001>

<bundles_post_ra>
// kernel: tpu_custom_call.1
= control target key start
LH: loop header
LB: loop body
LE: loop exit
PB: predicated region body
PF: predicated region fallthrough
CT: control target
= control target key end

     0   :  { %7 = vsyncpa [#allocation4], 0  ;;  %s331_s0 = inlined_call_operand.hbm [shape: f32[16,128], index: 0, kind: input, shape index: {}]   ;;  %s332_s1 = inlined_call_operand.hbm [shape: f32[16,128], index: 1, kind: input, shape index: {}]   ;;  %s333_s2 = inlined_call_operand.hbm [shape: f32[8,128], index: 2, kind: output, shape index: {}]  }
   0x1   :  { %8 = vsyncpa [#allocation7], 0 }
   0x2   :  { %9 = vsyncpa [#allocation5], 0  ;;  %s263_s9 = smov [#allocation3]   ;;  %s191_s13 = scalar_lea.hbm %s331_s0, 256 }
   0x3   :  { %s19_s10 = sshll.u32 %s263_s9, 4  ;;  %p192_p0 = scmp.ne.s32.totalorder %s331_s0, %s191_s13  ;;  %s20_s10 = int_to_ptr.vmem [resolvable:$true] %s19_s10 }
   0x4   :  { %p195_p1 = scmp.lt.u32.totalorder %s191_s13, %s331_s0 }
   0x6   :  { %p197_p2 = pnand %p195_p1, %p192_p0 }
   0x8   :  { %200 = shalt.err (!%p197_p2)
}
   0x9   :  { %s201_s18 = scalar_lea.vmem %s20_s10, 256  ;;  %p206_p4 = scmp.lt.s32.totalorder %s20_s10, %s20_s10 }
   0xa   :  { %p202_p3 = scmp.ne.s32.totalorder %s20_s10, %s201_s18  ;;  %p207_p5 = scmp.lt.s32.totalorder %s201_s18, %s201_s18 }
   0xc   :  { %p208_p6 = por %p207_p5, %p206_p4 }
   0xe   :  { %p209_p7 = pnand %p208_p6, %p202_p3 }
  0x10   :  { %212 = shalt.err (!%p209_p7)
}
  0x11   :  { %s264_s19 = smov 128   ;;  %s265_s20 = smov 8  }
  0x12   :  { %25 = dma.hbm_to_vmem [thread:$0]  %s331_s0, 256, %s20_s10, [#allocation4], %s264_s19, %s264_s19, %s265_s20  }
  0x13   :  { %s266_s23 = smov [#allocation6]   ;;  %s213_s27 = scalar_lea.hbm %s332_s1, 256 }
  0x14   :  { %s35_s24 = sshll.u32 %s266_s23, 4  ;;  %p214_p8 = scmp.ne.s32.totalorder %s332_s1, %s213_s27  ;;  %s36_s24 = int_to_ptr.vmem [resolvable:$true] %s35_s24 }
  0x15   :  { %p217_p9 = scmp.lt.u32.totalorder %s213_s27, %s332_s1 }
  0x17   :  { %p219_p10 = pnand %p217_p9, %p214_p8 }
  0x19   :  { %222 = shalt.err (!%p219_p10)
}
  0x1a   :  { %s223_s4 = scalar_lea.vmem %s36_s24, 256  ;;  %p228_p12 = scmp.lt.s32.totalorder %s36_s24, %s36_s24 }
  0x1b   :  { %p224_p11 = scmp.ne.s32.totalorder %s36_s24, %s223_s4  ;;  %p229_p13 = scmp.lt.s32.totalorder %s223_s4, %s223_s4 }
  0x1d   :  { %p230_p0 = por %p229_p13, %p228_p12 }
  0x1f   :  { %p231_p1 = pnand %p230_p0, %p224_p11 }
  0x21   :  { %234 = shalt.err (!%p231_p1)
}
  0x22   :  { %41 = dma.hbm_to_vmem [thread:$0]  %s332_s1, 256, %s36_s24, [#allocation7], %s264_s19, %s264_s19, %s265_s20  }
  0x23   :  { %257 = dma.done.wait [#allocation4], 256  }
  0x24   :  { %258 = vsyncadd [#allocation4], 4294967040 }
  0x25   :  { %259 = dma.done.wait [#allocation7], 256  }
  0x26   :  { %260 = vsyncadd [#allocation7], 4294967040  ;;  %v307_v0 = vld [vmem:[#allocation3] sm:$0xff]  ;;  %v309_v1 = vld [vmem:[#allocation3 + $0x8] sm:$0xff]  ;;  %s267_s1 = smov [#allocation8]  }
  0x27   :  { %v61_v2 = vand.u32 2147483647, %v307_v0  ;;  %v62_v3 = vand.u32 2147483647, %v309_v1  ;;  %v59_v12 = vld [vmem:[#allocation6] sm:$0xff]  ;;  %v60_v14 = vld [vmem:[#allocation6 + $0x8] sm:$0xff] }
  0x28   :  { %vm99_vm0 = vcmp.ge.f32.partialorder %v307_v0, 0.0  ;;  %vm100_vm1 = vcmp.ge.f32.partialorder %v309_v1, 0.0  ;;  %v107_v18 = vsub.f32 1.0, %v59_v12  ;;  %v108_v20 = vsub.f32 1.0, %v60_v14  ;;  %s160_s6 = sshll.u32 %s267_s1, 4  ;;  %s161_s6 = int_to_ptr.vmem [resolvable:$true] %s160_s6 }
  0x29   :  { %v63_v4 = vsub.f32 0.0, %v61_v2  ;;  %v64_v5 = vsub.f32 0.0, %v62_v3  ;;  %v69_v42 = vmax.f32 %v307_v0, 0.0  ;;  %v71_v43 = vmul.f32 %v59_v12, %v307_v0  ;;  %s235_s7 = scalar_lea.vmem %s161_s6, 128  ;;  %p240_p3 = scmp.lt.s32.totalorder %s161_s6, %s161_s6 }
  0x2a   :  { %v70_v44 = vmax.f32 %v309_v1, 0.0  ;;  %v72_v45 = vmul.f32 %v60_v14, %v309_v1  ;;  %v115_v51 = vmul.f32 0.25, %v59_v12  ;;  %v117_v52 = vmul.f32 0.75, %v107_v18  ;;  %p236_p2 = scmp.ne.s32.totalorder %s161_s6, %s235_s7  ;;  %p241_p4 = scmp.lt.s32.totalorder %s235_s7, %s235_s7 }
  0x2b   :  { %v65_v6 = vmul.f32 1.442695, %v63_v4  ;;  %v67_v7 = vmul.f32 1.442695, %v64_v5  ;;  %v73_v50 = vsub.f32 %v69_v42, %v71_v43  ;;  %v116_v55 = vmul.f32 0.25, %v60_v14 }
  0x2c   :  { %v74_v53 = vsub.f32 %v70_v44, %v72_v45  ;;  %v118_v56 = vmul.f32 0.75, %v108_v20  ;;  %v119_v59 = vadd.f32 %v117_v52, %v115_v51  ;;  %p242_p5 = por %p241_p4, %p240_p3 }
  0x2d   :  { %175 = vpow2.f32 %v65_v6 }
  0x2e   :  { %177 = vpow2.f32 %v67_v7  ;;  %v120_v62 = vadd.f32 %v118_v56, %v116_v55  ;;  %p243_p6 = pnand %p242_p5, %p236_p2 }
  0x37   :  { %v176_v8 = vpop.eup %175 }
  0x38   :  { %v178_v9 = vpop.eup %177  ;;  %v75_v10 = vadd.f32 1.0, %v176_v8  ;;  %v78_v28 = vmul.f32 -0.5, %v176_v8  ;;  %v81_v37 = vand.u32 2147483647, %v176_v8 }
  0x39   :  { %v84_v11 = vadd.f32 1.0, %v178_v9  ;;  %v87_v30 = vmul.f32 -0.5, %v178_v9  ;;  %v90_v41 = vand.u32 2147483647, %v178_v9 }
  0x3a   :  { %179 = vrcp.f32 %v75_v10  ;;  %v79_v34 = vadd.f32 1.0, %v78_v28  ;;  %vm82_vm2 = vcmp.lt.f32.partialorder %v81_v37, 0.0004427343 }
  0x3b   :  { %181 = vrcp.f32 %v84_v11  ;;  %v88_v38 = vadd.f32 1.0, %v87_v30  ;;  %vm91_vm3 = vcmp.lt.f32.partialorder %v90_v41, 0.0004427343 }
  0x3c   :  { %183 = vlog2.f32 %v75_v10  ;;  %v80_v47 = vmul.f32 %v176_v8, %v79_v34 }
  0x3d   :  { %185 = vlog2.f32 %v84_v11  ;;  %v89_v49 = vmul.f32 %v178_v9, %v88_v38 }
  0x44   :  { %v180_v13 = vpop.eup %179 }
  0x45   :  { %v182_v15 = vpop.eup %181  ;;  %v101_v16 = vmul.f32 %v180_v13, %v176_v8 }
  0x46   :  { %v102_v17 = vmul.f32 %v182_v15, %v178_v9  ;;  %v184_v36 = vpop.eup %183 }
  0x47   :  { %v103_v19 = vsel %vm99_vm0, %v180_v13, %v101_v16  ;;  %v186_v40 = vpop.eup %185  ;;  %v77_v46 = vmul.f32 0.6931472, %v184_v36 }
  0x48   :  { %v104_v21 = vsel %vm100_vm1, %v182_v15, %v102_v17  ;;  %v105_v22 = vmul.f32 %v103_v19, %v59_v12  ;;  %v109_v23 = vsub.f32 1.0, %v103_v19  ;;  %v86_v48 = vmul.f32 0.6931472, %v186_v40 }
  0x49   :  { %v106_v24 = vmul.f32 %v104_v21, %v60_v14  ;;  %v110_v25 = vsub.f32 1.0, %v104_v21  ;;  %v83_v54 = vsel %vm82_vm2, %v80_v47, %v77_v46 }
  0x4a   :  { %v111_v26 = vmul.f32 %v109_v23, %v107_v18  ;;  %v92_v57 = vsel %vm91_vm3, %v89_v49, %v86_v48  ;;  %v93_v58 = vadd.f32 %v83_v54, %v73_v50 }
  0x4b   :  { %v112_v27 = vmul.f32 %v110_v25, %v108_v20  ;;  %v94_v61 = vadd.f32 %v92_v57, %v74_v53 }
  0x4c   :  { %v113_v29 = vadd.f32 %v111_v26, %v105_v22  ;;  %v141_v5 = vmul.f32 %v119_v59, %v93_v58 }
  0x4d   :  { %v114_v31 = vadd.f32 %v112_v27, %v106_v24  ;;  %v142_v8 = vmul.f32 %v120_v62, %v94_v61 }
  0x4e   :  { %v121_v32 = vsub.f32 1.0, %v113_v29 }
  0x4f   :  { %v122_v33 = vsub.f32 1.0, %v114_v31 }
  0x50   :  { %v123_v35 = vmax.f32 %v121_v32, 0.0 }
  0x51   :  { %v124_v39 = vmax.f32 %v122_v33, 0.0 }
  0x52   :  { %187 = vrsqrt.f32 %v123_v35  ;;  %vm127_vm4 = vcmp.eq.f32.partialorder %v123_v35, inf  ;;  %v130_v63 = vand.u32 2147483648, %v123_v35  ;;  %vm129_vm5 = vcmp.eq.f32.partialorder %v123_v35, 0.0 }
  0x53   :  { %189 = vrsqrt.f32 %v124_v39  ;;  %vm134_vm6 = vcmp.eq.f32.partialorder %v124_v39, inf  ;;  %v137_v2 = vand.u32 2147483648, %v124_v39  ;;  %vm136_vm7 = vcmp.eq.f32.partialorder %v124_v39, 0.0 }
  0x5c   :  { %v188_v60 = vpop.eup %187 }
  0x5d   :  { %v190_v0 = vpop.eup %189  ;;  %v126_v1 = vmul.f32 %v188_v60, %v123_v35 }
  0x5e   :  { %v133_v3 = vmul.f32 %v190_v0, %v124_v39 }
  0x5f   :  { %v128_v4 = vsel %vm127_vm4, %v123_v35, %v126_v1 }
  0x60   :  { %v131_v6 = vsel %vm129_vm5, %v130_v63, %v128_v4  ;;  %v135_v7 = vsel %vm134_vm6, %v124_v39, %v133_v3 }
  0x61   :  { %v138_v9 = vsel %vm136_vm7, %v137_v2, %v135_v7  ;;  %v139_v10 = vmul.f32 %v131_v6, %v123_v35 }
  0x62   :  { %v140_v11 = vmul.f32 %v138_v9, %v124_v39 }
  0x63   :  { %v143_v12 = vmul.f32 %v141_v5, %v139_v10 }
  0x64   :  { %v144_v13 = vmul.f32 %v142_v8, %v140_v11 }
  0x66   :  { %v146_v14 = vadd.f32 %v144_v13, %v143_v12 }
  0x68   :  { %153 = vst [vmem:[#allocation8] sm:$0xff] %v146_v14 }
  0x69   :  { %246 = shalt.err (!%p243_p6)
}
  0x6a   :  { %s247_s10 = scalar_lea.hbm %s333_s2, 128 }
  0x6b   :  { %p248_p7 = scmp.ne.s32.totalorder %s333_s2, %s247_s10  ;;  %p251_p8 = scmp.lt.u32.totalorder %s247_s10, %s333_s2 }
  0x6d   :  { %p253_p9 = pnand %p251_p8, %p248_p7 }
  0x6f   :  { %256 = shalt.err (!%p253_p9)
}
  0x70   :  { %163 = dma.vmem_to_hbm [thread:$0]  %s161_s6, 128, %s333_s2, [#allocation5]  }
  0x71   :  { %261 = dma.done.wait [#allocation5], 128  }
  0x72   :  { %262 = vsyncadd [#allocation5], 4294967168 }
  0x73   :  { %167 = vsyncpa [#allocation4], 1 }
  0x74   :  { %168 = vsyncpa [#allocation7], 1 }
  0x75   :  { %169 = vsyncpa [#allocation5], 1 }

</bundles_post_ra>
